<compile_context>
chip_gen: v7x
topology: tpu7x:2x2x1
jax: 0.10.0
libtpu: 0.0.40
codegen_flags: <defaults>
</compile_context>

<pallas_src>
import math

import jax
import jax.numpy as jnp
from jax import lax
from jax.experimental import pallas as pl
from jax.experimental.pallas import tpu as pltpu

# ----------------------------- synthetic config -----------------------------
IMC = 3
IMH = IMW = 16
MAX_STRIDE = 8
WIDTH = 32                         # dec_blocks[0].in_channels
ZDIM = 8                           # latent channels of the latent block
LMB_EMBED_DIM = (16, 32)           # config['lmb_embed_dim']
D0, D1 = LMB_EMBED_DIM
SIN_PERIOD = 64.0                  # config['sin_period']
LMB_RANGE = (16.0, 2048.0)         # config['lmb_range']
LOG2_E = math.log2(math.e)
MAX_LOG_LMB = math.log(8192)
P_IN = MAX_STRIDE * MAX_STRIDE * IMC    # 192
P_OUT = MAX_STRIDE * MAX_STRIDE * IMC   # 192  (sweep to 256 for fully unmasked vst)
SAMP_LANES = 128                        # lane-padded per-sample conditioning row
TOKEN_TILE_CAP = 1024                   # rows; 2x dbl-buffered bf16 I/O ~1.6 MiB

# Row offsets inside the packed f32 weight blob `wA`; all multiples of 8 so the
# in-kernel static slices land exactly on sublane-tile boundaries.
R_W1   = 0                         # (D0, D1)       lmb MLP layer 1
R_W2   = R_W1   + D0               # (D1, D1)       lmb MLP layer 2
R_WEMB = R_W2   + D1               # (D1, WIDTH)    encoder lmb conditioning
R_WBE  = R_WEMB + D1               # (D1, WIDTH)    dec block embedding projection
R_WB1  = R_WBE  + D1               # (WIDTH, WIDTH) dec block conv
R_WQP  = R_WB1  + WIDTH            # (WIDTH, 4*Z)   fused [posterior_dec | prior] head
R_WQE  = R_WQP  + WIDTH            # (WIDTH, 4*Z)   posterior_enc head (cols 2Z..4Z zero)
R_WZ   = R_WQE  + WIDTH            # (ZDIM, WIDTH)  z_proj
R_BIAS = R_WZ   + ZDIM             # (8, WIDTH)     stacked biases
WA_ROWS = R_BIAS + 8
BI_B1, BI_B2, BI_BENC, BI_DBIAS, BI_BB1, BI_BQP, BI_BZ = range(7)


def _gelu(x):
    # tanh approximation -> routes the transcendental to the EUP slot (per review).
    return jax.nn.gelu(x, approximate=True)


def _softplus(x):
    # numerically stable softplus using only exp/log (EUP-friendly)
    return jnp.maximum(x, 0.0) + jnp.log(1.0 + jnp.exp(-jnp.abs(x)))


# ------------------------------- fused kernel --------------------------------
def make_kernel(nt, hw, npix):
    """Build the gridded kernel; nt = token tiles per sample, hw = H*W, npix = C*H*W."""
    inv_npix = 1.0 / float(npix)
    kl_scale = LOG2_E / float(hw)
    f32 = jnp.float32

    def kernel(samp_ref, im_ref, wA_ref, wE_ref, wD_ref, xhat_ref, met_ref):
        t = pl.program_id(1)

        def dotf(a, b):
            return jnp.dot(a, b, preferred_element_type=f32)

        # ---- VMEM-resident weights (constant index_map, DMA'd once) ----------
        w1    = wA_ref[R_W1:R_W1 + D0, :]
        w2    = wA_ref[R_W2:R_W2 + D1, :]
        w_emb = wA_ref[R_WEMB:R_WEMB + D1, :]
        w_be  = wA_ref[R_WBE:R_WBE + D1, :]
        w_b1  = wA_ref[R_WB1:R_WB1 + WIDTH, :]
        w_qp  = wA_ref[R_WQP:R_WQP + WIDTH, :]
        w_qe  = wA_ref[R_WQE:R_WQE + WIDTH, :]
        w_z   = wA_ref[R_WZ:R_WZ + ZDIM, :]
        biases = wA_ref[R_BIAS:R_BIAS + 8, :]      # one aligned (8, W) load / step
        b1     = biases[BI_B1:BI_B1 + 1, :]
        b2     = biases[BI_B2:BI_B2 + 1, :]
        b_enc  = biases[BI_BENC:BI_BENC + 1, :]
        d_bias = biases[BI_DBIAS:BI_DBIAS + 1, :]
        b_b1   = biases[BI_BB1:BI_BB1 + 1, :]
        b_qp   = biases[BI_BQP:BI_BQP + 1, :]
        b_z    = biases[BI_BZ:BI_BZ + 1, :]
        w_dec  = wD_ref[0:WIDTH, :]                              # bf16 (WIDTH, P_OUT)
        b_dec  = wD_ref[WIDTH:WIDTH + 1, :].astype(f32)          # (1, P_OUT)

        # ---- per-sample conditioning (tiny 1-row matmuls; no routing matmuls) ----
        samp = samp_ref[...]                                     # (1, 128)
        sin_emb = samp[:, 0:D0]                                  # (1, D0)
        lmb_s = samp[:, D0:D0 + 1]                               # (1, 1)
        emb = dotf(_gelu(dotf(sin_emb, w1) + b1), w2) + b2       # (1, D1)
        cond_row = dotf(emb, w_emb) + b_enc                      # (1, WIDTH)  enc cond
        f_s = _gelu(dotf(d_bias + dotf(emb, w_be), w_b1) + b_b1) # (1, WIDTH)  top-down
        qp_dec_row = dotf(f_s, w_qp) + b_qp                      # (1, 4*ZDIM)
        f_sz_row = f_s + b_z                                     # b_z folded per-sample

        # ---- per-token-tile compute (bf16 I/O, f32 accumulate) --------------
        im_blk = im_ref[...]                                     # (TM, P_IN) bf16
        enc_tok = _gelu(dotf(im_blk, wE_ref[...]) + cond_row)    # (TM, WIDTH) f32

        # fused [posterior | prior] head: cols [0:2Z]=q, [2Z:3Z]=pm, [3Z:4Z]=plogv
        qp = dotf(enc_tok, w_qe) + qp_dec_row                    # (TM, 4*ZDIM)
        qm    = qp[:, 0:ZDIM]
        qlogv = qp[:, ZDIM:2 * ZDIM]
        pm    = qp[:, 2 * ZDIM:3 * ZDIM]
        plogv = _softplus(qp[:, 3 * ZDIM:4 * ZDIM] + 2.3) - 2.3  # transform_prior
        kl = 0.5 * (plogv - qlogv
                    + (jnp.exp(qlogv) + (qm - pm) ** 2) * jnp.exp(-plogv) - 1.0)

        # TODO(synk): DiscretizedGaussian quantization / uniform noise has no clean
        # Pallas equivalent; use the deterministic posterior mean as z (eval proxy).
        z = qm
        f_tok = f_sz_row + dotf(z, w_z)                          # (TM, WIDTH) f32
        x_hat = dotf(f_tok.astype(jnp.bfloat16), w_dec) + b_dec  # (TM, P_OUT) f32
        xhat_ref[...] = x_hat.astype(xhat_ref.dtype)

        # ---- per-sample metrics accumulator (P3: init -> accumulate -> finalize) ----
        @pl.when(t == 0)
        def _init():
            met_ref[...] = jnp.zeros_like(met_ref)

        x_tgt = 2.0 * im_blk.astype(f32) - 1.0                   # preprocess(im)
        d = x_hat - x_tgt
        d2 = 0.5 * (jnp.clip(x_hat, -1.0, 1.0) - x_tgt)          # postprocess(x_hat)-im
        kl_s = jnp.sum(kl)
        sq_s = jnp.sum(d * d)
        sq2_s = jnp.sum(d2 * d2)
        lane = lax.broadcasted_iota(jnp.int32, met_ref.shape, 1)
        contrib = (jnp.where(lane == 0, kl_s, 0.0)
                   + jnp.where(lane == 1, sq_s, 0.0)
                   + jnp.where(lane == 2, sq2_s, 0.0))
        met_ref[...] = met_ref[...] + contrib

        @pl.when(t == nt - 1)
        def _finalize():
            raw = met_ref[...]
            bpp  = raw[:, 0:1] * kl_scale
            mse  = raw[:, 1:2] * inv_npix
            imse = raw[:, 2:3] * inv_npix
            loss = bpp + lmb_s * mse
            met_ref[...] = (jnp.where(lane == 0, loss, 0.0)
                            + jnp.where(lane == 1, bpp, 0.0)
                            + jnp.where(lane == 2, mse, 0.0)
                            + jnp.where(lane == 3, imse, 0.0))

    return kernel


def _pick_token_tile(nhw):
    """Largest token tile <= cap that is a full dim or a multiple-of-8 divisor."""
    if nhw <= TOKEN_TILE_CAP:
        return nhw                           # full-dim block (always layout-legal)
    for tm in range(TOKEN_TILE_CAP, 7, -8):
        if nhw % tm == 0:
            return tm
    assert nhw % 8 == 0, "token count per sample must be a multiple of 8 when tiled"
    return 8


# ------------------------------ parameter init --------------------------------
def init_params(key):
    ks = jax.random.split(key, 11)

    def dense(k, fan_in, fan_out):
        return jax.random.normal(k, (fan_in, fan_out), jnp.float32) / math.sqrt(fan_in)

    return dict(
        # lmb_embedding MLP
        w1=dense(ks[0], D0, D1), b1=jnp.zeros((1, D1), jnp.float32),
        w2=dense(ks[1], D1, D1), b2=jnp.zeros((1, D1), jnp.float32),
        # encoder (patchify conv + lmb conditioning)
        w_enc=dense(ks[2], P_IN, WIDTH), b_enc=jnp.zeros((1, WIDTH), jnp.float32),
        w_embproj=dense(ks[3], D1, WIDTH),
        # decoder
        dec_bias=jnp.zeros((1, WIDTH), jnp.float32),
        w_be=dense(ks[4], D1, WIDTH),
        w_b1=dense(ks[5], WIDTH, WIDTH), b_b1=jnp.zeros((1, WIDTH), jnp.float32),
        w_q_enc=dense(ks[6], WIDTH, 2 * ZDIM),
        w_q_dec=dense(ks[7], WIDTH, 2 * ZDIM), b_q=jnp.zeros((1, 2 * ZDIM), jnp.float32),
        w_p=dense(ks[8], WIDTH, 2 * ZDIM), b_p=jnp.zeros((1, 2 * ZDIM), jnp.float32),
        w_z=dense(ks[9], ZDIM, WIDTH), b_z=jnp.zeros((1, WIDTH), jnp.float32),
        w_dec=dense(ks[10], WIDTH, P_OUT), b_dec=jnp.zeros((1, P_OUT), jnp.float32),
    )


def pack_params(params):
    """Pack weights into three blobs (f32 small weights, bf16 encoder, bf16 decoder)."""
    f32 = jnp.float32
    # packing layout relies on these equalities (see correctness_concerns)
    assert D1 == WIDTH and 4 * ZDIM == WIDTH
    # fold preprocess (im - 0.5) * 2 into the encoder head
    w_enc_f = 2.0 * params['w_enc']
    b_enc_f = params['b_enc'] - jnp.sum(params['w_enc'], axis=0, keepdims=True)
    # merged [posterior_dec | prior] head and zero-padded posterior_enc head
    w_qp = jnp.concatenate([params['w_q_dec'], params['w_p']], axis=1)          # (W, 4Z)
    b_qp = jnp.concatenate([params['b_q'], params['b_p']], axis=1)              # (1, 4Z)
    w_qe = jnp.concatenate([params['w_q_enc'],
                            jnp.zeros((WIDTH, 2 * ZDIM), f32)], axis=1)         # (W, 4Z)
    biases = jnp.concatenate([params['b1'], params['b2'], b_enc_f,
                              params['dec_bias'], params['b_b1'], b_qp,
                              params['b_z'], jnp.zeros((1, WIDTH), f32)], axis=0)  # (8, W)
    wA = jnp.concatenate([params['w1'], params['w2'], params['w_embproj'],
                          params['w_be'], params['w_b1'], w_qp, w_qe,
                          params['w_z'], biases], axis=0)                       # (224, 32)
    assert wA.shape == (WA_ROWS, WIDTH)
    wE = w_enc_f.astype(jnp.bfloat16)                                           # (192, 32)
    wD = jnp.concatenate([params['w_dec'], params['b_dec'],
                          jnp.zeros((7, P_OUT), f32)], axis=0).astype(jnp.bfloat16)  # (40, 192)
    return {'wA': wA, 'wE': wE, 'wD': wD}


# ---------------------------------- forward ------------------------------------
def variable_rate_lossy_vae_forward(im_nchw, packed, lmb=None):
    """Eval-mode forward(im) -> metrics.  im_nchw in [0, 1], NCHW.  Fully jittable."""
    B, C, H, W = im_nchw.shape
    assert H % MAX_STRIDE == 0 and W % MAX_STRIDE == 0 and C == IMC
    nh, nw = H // MAX_STRIDE, W // MAX_STRIDE
    nhw = nh * nw

    if lmb is None:
        lmb = jnp.full((B,), LMB_RANGE[1], jnp.float32)        # default_lmb = lmb_range[1]

    # sinusoidal lambda embedding (tiny XLA glue)
    scaled = jnp.log(lmb) * SIN_PERIOD / MAX_LOG_LMB
    half = D0 // 2
    freqs = jnp.exp(-math.log(SIN_PERIOD) * jnp.arange(half, dtype=jnp.float32) / half)
    args = scaled[:, None] * freqs[None, :]
    sin_emb = jnp.concatenate([jnp.cos(args), jnp.sin(args)], axis=-1)         # (B, D0)
    samp = jnp.concatenate(
        [sin_emb, lmb[:, None],
         jnp.zeros((B, SAMP_LANES - D0 - 1), jnp.float32)], axis=-1)[:, None, :]  # (B,1,128)

    # patchify (space-to-depth by max_stride) into (B, NHW, P_IN), bf16.
    # TODO(synk): space-to-depth is a strided interleave a BlockSpec index_map cannot
    # express as rectangular tiles, so this transpose stays in XLA (in bf16).
    im_tok = (im_nchw.astype(jnp.bfloat16)
              .reshape(B, C, nh, MAX_STRIDE, nw, MAX_STRIDE)
              .transpose(0, 2, 4, 1, 3, 5)
              .reshape(B, nhw, P_IN))

    tm = _pick_token_tile(nhw)
    nt = nhw // tm
    kernel = make_kernel(nt, H * W, C * H * W)

    flops = 2 * B * nhw * (P_IN * WIDTH + WIDTH * 4 * ZDIM + ZDIM * WIDTH + WIDTH * P_OUT)
    bytes_accessed = (B * nhw * P_IN * 2 + B * nhw * P_OUT * 2
                      + WA_ROWS * WIDTH * 4 + P_IN * WIDTH * 2 + (WIDTH + 8) * P_OUT * 2
                      + B * SAMP_LANES * 4 + B * 8 * 128 * 4)
    cost = pl.CostEstimate(flops=flops,
                           transcendentals=B * nhw * (WIDTH + 4 * ZDIM),
                           bytes_accessed=bytes_accessed)

    xhat_tok, met = pl.pallas_call(
        kernel,
        grid=(B, nt),
        in_specs=[
            pl.BlockSpec((None, 1, SAMP_LANES), lambda b, t: (b, 0, 0)),   # per-sample cond
            pl.BlockSpec((None, tm, P_IN),      lambda b, t: (b, t, 0)),   # token tile
            pl.BlockSpec((WA_ROWS, WIDTH),      lambda b, t: (0, 0)),      # resident weights
            pl.BlockSpec((P_IN, WIDTH),         lambda b, t: (0, 0)),
            pl.BlockSpec((WIDTH + 8, P_OUT),    lambda b, t: (0, 0)),
        ],
        out_specs=(
            pl.BlockSpec((None, tm, P_OUT), lambda b, t: (b, t, 0)),       # x_hat tiles
            pl.BlockSpec((None, 8, 128),    lambda b, t: (b, 0, 0)),       # metrics accumulator
        ),
        out_shape=(
            jax.ShapeDtypeStruct((B, nhw, P_OUT), jnp.bfloat16),
            jax.ShapeDtypeStruct((B, 8, 128), jnp.float32),
        ),
        compiler_params=pltpu.CompilerParams(
            dimension_semantics=("parallel", "arbitrary"),
            vmem_limit_bytes=32 * 1024 * 1024),
        cost_estimate=cost,
    )(samp, im_tok, packed['wA'], packed['wE'], packed['wD'])

    # unpatchify x_hat back to NCHW (layout glue, bf16 traffic)
    x_hat = (xhat_tok.reshape(B, nh, nw, C, MAX_STRIDE, MAX_STRIDE)
             .transpose(0, 3, 1, 4, 2, 5)
             .reshape(B, C, H, W)
             .astype(jnp.float32))

    met_rows = met[:, 0, :]                                      # (B, 128) -> lanes 0..3
    metrics = {
        'loss': jnp.mean(met_rows[:, 0]),
        'bpp': jnp.mean(met_rows[:, 1]),
        'mse': jnp.mean(met_rows[:, 2]),
        'psnr': -10.0 * jnp.log10(jnp.mean(met_rows[:, 3])),
        'x_hat': x_hat,
    }
    return metrics


# ----------------------------------- main ---------------------------------------
if __name__ == "__main__":
    key = jax.random.PRNGKey(0)
    k_im, k_par = jax.random.split(key)
    B = 2
    im = jax.random.uniform(k_im, (B, IMC, IMH, IMW), jnp.float32, 0.0, 1.0)  # values in [0, 1]
    params = init_params(k_par)
    packed = pack_params(params)       # one-time host-side weight packing / folding

    fwd = jax.jit(variable_rate_lossy_vae_forward)
    metrics = fwd(im, packed)
    jax.block_until_ready(metrics['loss'])
    jax.block_until_ready(metrics['psnr'])
    jax.block_until_ready(metrics['x_hat'])

    print("KERNEL_OK")
</pallas_src>

<mosaic_0001>
module attributes {stable_mosaic.version = 11 : i64} {
  func.func @kernel(%arg0: i32, %arg1: i32, %arg2: memref<1x1x128xf32, #tpu.memory_space<vmem>>, %arg3: memref<1x4x192xbf16, #tpu.memory_space<vmem>>, %arg4: memref<224x32xf32, #tpu.memory_space<vmem>>, %arg5: memref<192x32xbf16, #tpu.memory_space<vmem>>, %arg6: memref<40x192xbf16, #tpu.memory_space<vmem>>, %arg7: memref<1x4x192xbf16, #tpu.memory_space<vmem>>, %arg8: memref<1x8x128xf32, #tpu.memory_space<vmem>>) attributes {dimension_semantics = [#tpu.dimension_semantics<parallel>, #tpu.dimension_semantics<arbitrary>], iteration_bounds = array<i64: 2, 1>, scalar_prefetch = 0 : i64, scratch_operands = 0 : i64, tpu.core_type = #tpu.core_type<tc>, window_params = [{transform_indices = @transform_0, window_bounds = array<i64: 1, 1, 128>}, {transform_indices = @transform_1, window_bounds = array<i64: 1, 4, 192>}, {pipeline_mode = #tpu.pipeline_mode<synchronous>, transform_indices = @transform_2, window_bounds = array<i64: 224, 32>}, {pipeline_mode = #tpu.pipeline_mode<synchronous>, transform_indices = @transform_3, window_bounds = array<i64: 192, 32>}, {pipeline_mode = #tpu.pipeline_mode<synchronous>, transform_indices = @transform_4, window_bounds = array<i64: 40, 192>}, {transform_indices = @transform_5, window_bounds = array<i64: 1, 4, 192>}, {transform_indices = @transform_6, window_bounds = array<i64: 1, 8, 128>}]} {
    %c0 = arith.constant 0 : index
    %c0_0 = arith.constant 0 : index
    %0 = vector.load %arg4[%c0, %c0_0] : memref<224x32xf32, #tpu.memory_space<vmem>>, vector<16x32xf32>
    %c16 = arith.constant 16 : index
    %c0_1 = arith.constant 0 : index
    %1 = vector.load %arg4[%c16, %c0_1] : memref<224x32xf32, #tpu.memory_space<vmem>>, vector<32x32xf32>
    %c48 = arith.constant 48 : index
    %c0_2 = arith.constant 0 : index
    %2 = vector.load %arg4[%c48, %c0_2] : memref<224x32xf32, #tpu.memory_space<vmem>>, vector<32x32xf32>
    %c80 = arith.constant 80 : index
    %c0_3 = arith.constant 0 : index
    %3 = vector.load %arg4[%c80, %c0_3] : memref<224x32xf32, #tpu.memory_space<vmem>>, vector<32x32xf32>
    %c112 = arith.constant 112 : index
    %c0_4 = arith.constant 0 : index
    %4 = vector.load %arg4[%c112, %c0_4] : memref<224x32xf32, #tpu.memory_space<vmem>>, vector<32x32xf32>
    %c144 = arith.constant 144 : index
    %c0_5 = arith.constant 0 : index
    %5 = vector.load %arg4[%c144, %c0_5] : memref<224x32xf32, #tpu.memory_space<vmem>>, vector<32x32xf32>
    %c176 = arith.constant 176 : index
    %c0_6 = arith.constant 0 : index
    %6 = vector.load %arg4[%c176, %c0_6] : memref<224x32xf32, #tpu.memory_space<vmem>>, vector<32x32xf32>
    %c208 = arith.constant 208 : index
    %c0_7 = arith.constant 0 : index
    %7 = vector.load %arg4[%c208, %c0_7] : memref<224x32xf32, #tpu.memory_space<vmem>>, vector<8x32xf32>
    %c216 = arith.constant 216 : index
    %c0_8 = arith.constant 0 : index
    %8 = vector.load %arg4[%c216, %c0_8] : memref<224x32xf32, #tpu.memory_space<vmem>>, vector<8x32xf32>
    %9 = vector.extract_strided_slice %8 {offsets = [0, 0], sizes = [1, 32], strides = [1, 1]} : vector<8x32xf32> to vector<1x32xf32>
    %10 = vector.extract_strided_slice %8 {offsets = [1, 0], sizes = [1, 32], strides = [1, 1]} : vector<8x32xf32> to vector<1x32xf32>
    %11 = vector.extract_strided_slice %8 {offsets = [2, 0], sizes = [1, 32], strides = [1, 1]} : vector<8x32xf32> to vector<1x32xf32>
    %12 = vector.extract_strided_slice %8 {offsets = [3, 0], sizes = [1, 32], strides = [1, 1]} : vector<8x32xf32> to vector<1x32xf32>
    %13 = vector.extract_strided_slice %8 {offsets = [4, 0], sizes = [1, 32], strides = [1, 1]} : vector<8x32xf32> to vector<1x32xf32>
    %14 = vector.extract_strided_slice %8 {offsets = [5, 0], sizes = [1, 32], strides = [1, 1]} : vector<8x32xf32> to vector<1x32xf32>
    %15 = vector.extract_strided_slice %8 {offsets = [6, 0], sizes = [1, 32], strides = [1, 1]} : vector<8x32xf32> to vector<1x32xf32>
    %c0_9 = arith.constant 0 : index
    %c0_10 = arith.constant 0 : index
    %16 = vector.load %arg6[%c0_9, %c0_10] : memref<40x192xbf16, #tpu.memory_space<vmem>>, vector<32x192xbf16>
    %c32 = arith.constant 32 : index
    %c0_11 = arith.constant 0 : index
    %17 = vector.load %arg6[%c32, %c0_11] : memref<40x192xbf16, #tpu.memory_space<vmem>>, vector<1x192xbf16>
    %18 = arith.extf %17 : vector<1x192xbf16> to vector<1x192xf32>
    %c0_12 = arith.constant 0 : index
    %c0_13 = arith.constant 0 : index
    %c0_14 = arith.constant 0 : index
    %19 = vector.load %arg2[%c0_12, %c0_13, %c0_14] : memref<1x1x128xf32, #tpu.memory_space<vmem>>, vector<1x1x128xf32>
    %20 = vector.shape_cast %19 : vector<1x1x128xf32> to vector<1x128xf32>
    %21 = vector.extract_strided_slice %20 {offsets = [0, 0], sizes = [1, 16], strides = [1, 1]} : vector<1x128xf32> to vector<1x16xf32>
    %22 = vector.extract_strided_slice %20 {offsets = [0, 16], sizes = [1, 1], strides = [1, 1]} : vector<1x128xf32> to vector<1x1xf32>
    %cst = arith.constant dense<0.000000e+00> : vector<1x32xf32>
    %23 = tpu.matmul %21, %0, %cst {dimension_numbers = #tpu.dot_dimension_numbers<[1], [0], [0], [1], [0, 0, 1, 1], [], []>} : vector<1x16xf32>, vector<16x32xf32>, vector<1x32xf32> -> vector<1x32xf32>
    %24 = arith.addf %23, %9 : vector<1x32xf32>
    %25 = arith.mulf %24, %24 : vector<1x32xf32>
    %26 = arith.mulf %24, %25 : vector<1x32xf32>
    %cst_15 = arith.constant 4.471500e-02 : f32
    %27 = vector.broadcast %cst_15 : f32 to vector<1x32xf32>
    %28 = arith.mulf %27, %26 : vector<1x32xf32>
    %29 = arith.addf %24, %28 : vector<1x32xf32>
    %cst_16 = arith.constant 0.797884583 : f32
    %30 = vector.broadcast %cst_16 : f32 to vector<1x32xf32>
    %31 = arith.mulf %30, %29 : vector<1x32xf32>
    %32 = math.tanh %31 : vector<1x32xf32>
    %cst_17 = arith.constant 1.000000e+00 : f32
    %33 = vector.broadcast %cst_17 : f32 to vector<1x32xf32>
    %34 = arith.addf %33, %32 : vector<1x32xf32>
    %cst_18 = arith.constant 5.000000e-01 : f32
    %35 = vector.broadcast %cst_18 : f32 to vector<1x32xf32>
    %36 = arith.mulf %35, %34 : vector<1x32xf32>
    %37 = arith.mulf %24, %36 : vector<1x32xf32>
    %cst_19 = arith.constant dense<0.000000e+00> : vector<1x32xf32>
    %38 = tpu.matmul %37, %1, %cst_19 {dimension_numbers = #tpu.dot_dimension_numbers<[1], [0], [0], [1], [0, 0, 1, 1], [], []>} : vector<1x32xf32>, vector<32x32xf32>, vector<1x32xf32> -> vector<1x32xf32>
    %39 = arith.addf %38, %10 : vector<1x32xf32>
    %cst_20 = arith.constant dense<0.000000e+00> : vector<1x32xf32>
    %40 = tpu.matmul %39, %2, %cst_20 {dimension_numbers = #tpu.dot_dimension_numbers<[1], [0], [0], [1], [0, 0, 1, 1], [], []>} : vector<1x32xf32>, vector<32x32xf32>, vector<1x32xf32> -> vector<1x32xf32>
    %41 = arith.addf %40, %11 : vector<1x32xf32>
    %cst_21 = arith.constant dense<0.000000e+00> : vector<1x32xf32>
    %42 = tpu.matmul %39, %3, %cst_21 {dimension_numbers = #tpu.dot_dimension_numbers<[1], [0], [0], [1], [0, 0, 1, 1], [], []>} : vector<1x32xf32>, vector<32x32xf32>, vector<1x32xf32> -> vector<1x32xf32>
    %43 = arith.addf %12, %42 : vector<1x32xf32>
    %cst_22 = arith.constant dense<0.000000e+00> : vector<1x32xf32>
    %44 = tpu.matmul %43, %4, %cst_22 {dimension_numbers = #tpu.dot_dimension_numbers<[1], [0], [0], [1], [0, 0, 1, 1], [], []>} : vector<1x32xf32>, vector<32x32xf32>, vector<1x32xf32> -> vector<1x32xf32>
    %45 = arith.addf %44, %13 : vector<1x32xf32>
    %46 = arith.mulf %45, %45 : vector<1x32xf32>
    %47 = arith.mulf %45, %46 : vector<1x32xf32>
    %cst_23 = arith.constant 4.471500e-02 : f32
    %48 = vector.broadcast %cst_23 : f32 to vector<1x32xf32>
    %49 = arith.mulf %48, %47 : vector<1x32xf32>
    %50 = arith.addf %45, %49 : vector<1x32xf32>
    %cst_24 = arith.constant 0.797884583 : f32
    %51 = vector.broadcast %cst_24 : f32 to vector<1x32xf32>
    %52 = arith.mulf %51, %50 : vector<1x32xf32>
    %53 = math.tanh %52 : vector<1x32xf32>
    %cst_25 = arith.constant 1.000000e+00 : f32
    %54 = vector.broadcast %cst_25 : f32 to vector<1x32xf32>
    %55 = arith.addf %54, %53 : vector<1x32xf32>
    %cst_26 = arith.constant 5.000000e-01 : f32
    %56 = vector.broadcast %cst_26 : f32 to vector<1x32xf32>
    %57 = arith.mulf %56, %55 : vector<1x32xf32>
    %58 = arith.mulf %45, %57 : vector<1x32xf32>
    %cst_27 = arith.constant dense<0.000000e+00> : vector<1x32xf32>
    %59 = tpu.matmul %58, %5, %cst_27 {dimension_numbers = #tpu.dot_dimension_numbers<[1], [0], [0], [1], [0, 0, 1, 1], [], []>} : vector<1x32xf32>, vector<32x32xf32>, vector<1x32xf32> -> vector<1x32xf32>
    %60 = arith.addf %59, %14 : vector<1x32xf32>
    %61 = arith.addf %58, %15 : vector<1x32xf32>
    %c0_28 = arith.constant 0 : index
    %c0_29 = arith.constant 0 : index
    %c0_30 = arith.constant 0 : index
    %62 = vector.load %arg3[%c0_28, %c0_29, %c0_30] : memref<1x4x192xbf16, #tpu.memory_space<vmem>>, vector<1x4x192xbf16>
    %63 = vector.shape_cast %62 : vector<1x4x192xbf16> to vector<4x192xbf16>
    %c0_31 = arith.constant 0 : index
    %c0_32 = arith.constant 0 : index
    %64 = vector.load %arg5[%c0_31, %c0_32] : memref<192x32xbf16, #tpu.memory_space<vmem>>, vector<192x32xbf16>
    %cst_33 = arith.constant dense<0.000000e+00> : vector<4x32xf32>
    %65 = tpu.matmul %63, %64, %cst_33 {dimension_numbers = #tpu.dot_dimension_numbers<[1], [0], [0], [1], [0, 0, 1, 1], [], []>} : vector<4x192xbf16>, vector<192x32xbf16>, vector<4x32xf32> -> vector<4x32xf32>
    %66 = vector.broadcast %41 : vector<1x32xf32> to vector<4x32xf32>
    %67 = arith.addf %65, %66 : vector<4x32xf32>
    %68 = arith.mulf %67, %67 : vector<4x32xf32>
    %69 = arith.mulf %67, %68 : vector<4x32xf32>
    %cst_34 = arith.constant 4.471500e-02 : f32
    %70 = vector.broadcast %cst_34 : f32 to vector<4x32xf32>
    %71 = arith.mulf %70, %69 : vector<4x32xf32>
    %72 = arith.addf %67, %71 : vector<4x32xf32>
    %cst_35 = arith.constant 0.797884583 : f32
    %73 = vector.broadcast %cst_35 : f32 to vector<4x32xf32>
    %74 = arith.mulf %73, %72 : vector<4x32xf32>
    %75 = math.tanh %74 : vector<4x32xf32>
    %cst_36 = arith.constant 1.000000e+00 : f32
    %76 = vector.broadcast %cst_36 : f32 to vector<4x32xf32>
    %77 = arith.addf %76, %75 : vector<4x32xf32>
    %cst_37 = arith.constant 5.000000e-01 : f32
    %78 = vector.broadcast %cst_37 : f32 to vector<4x32xf32>
    %79 = arith.mulf %78, %77 : vector<4x32xf32>
    %80 = arith.mulf %67, %79 : vector<4x32xf32>
    %cst_38 = arith.constant dense<0.000000e+00> : vector<4x32xf32>
    %81 = tpu.matmul %80, %6, %cst_38 {dimension_numbers = #tpu.dot_dimension_numbers<[1], [0], [0], [1], [0, 0, 1, 1], [], []>} : vector<4x32xf32>, vector<32x32xf32>, vector<4x32xf32> -> vector<4x32xf32>
    %82 = vector.broadcast %60 : vector<1x32xf32> to vector<4x32xf32>
    %83 = arith.addf %81, %82 : vector<4x32xf32>
    %84 = vector.extract_strided_slice %83 {offsets = [0, 0], sizes = [4, 8], strides = [1, 1]} : vector<4x32xf32> to vector<4x8xf32>
    %85 = vector.extract_strided_slice %83 {offsets = [0, 8], sizes = [4, 8], strides = [1, 1]} : vector<4x32xf32> to vector<4x8xf32>
    %86 = vector.extract_strided_slice %83 {offsets = [0, 16], sizes = [4, 8], strides = [1, 1]} : vector<4x32xf32> to vector<4x8xf32>
    %87 = vector.extract_strided_slice %83 {offsets = [0, 24], sizes = [4, 8], strides = [1, 1]} : vector<4x32xf32> to vector<4x8xf32>
    %cst_39 = arith.constant 2.300000e+00 : f32
    %88 = vector.broadcast %cst_39 : f32 to vector<4x8xf32>
    %89 = arith.addf %87, %88 : vector<4x8xf32>
    %cst_40 = arith.constant 0.000000e+00 : f32
    %90 = vector.broadcast %cst_40 : f32 to vector<4x8xf32>
    %91 = arith.maximumf %89, %90 : vector<4x8xf32>
    %92 = math.absf %89 : vector<4x8xf32>
    %cst_41 = arith.constant 0.000000e+00 : f32
    %93 = vector.broadcast %cst_41 : f32 to vector<4x8xf32>
    %94 = arith.subf %93, %92 : vector<4x8xf32>
    %95 = math.exp %94 : vector<4x8xf32>
    %cst_42 = arith.constant 1.000000e+00 : f32
    %96 = vector.broadcast %cst_42 : f32 to vector<4x8xf32>
    %97 = arith.addf %96, %95 : vector<4x8xf32>
    %98 = math.log %97 : vector<4x8xf32>
    %99 = arith.addf %91, %98 : vector<4x8xf32>
    %cst_43 = arith.constant 2.300000e+00 : f32
    %100 = vector.broadcast %cst_43 : f32 to vector<4x8xf32>
    %101 = arith.subf %99, %100 : vector<4x8xf32>
    %102 = arith.subf %101, %85 : vector<4x8xf32>
    %103 = math.exp %85 : vector<4x8xf32>
    %104 = arith.subf %84, %86 : vector<4x8xf32>
    %105 = arith.mulf %104, %104 : vector<4x8xf32>
    %106 = arith.addf %103, %105 : vector<4x8xf32>
    %cst_44 = arith.constant 0.000000e+00 : f32
    %107 = vector.broadcast %cst_44 : f32 to vector<4x8xf32>
    %108 = arith.subf %107, %101 : vector<4x8xf32>
    %109 = math.exp %108 : vector<4x8xf32>
    %110 = arith.mulf %106, %109 : vector<4x8xf32>
    %111 = arith.addf %102, %110 : vector<4x8xf32>
    %cst_45 = arith.constant 1.000000e+00 : f32
    %112 = vector.broadcast %cst_45 : f32 to vector<4x8xf32>
    %113 = arith.subf %111, %112 : vector<4x8xf32>
    %cst_46 = arith.constant 5.000000e-01 : f32
    %114 = vector.broadcast %cst_46 : f32 to vector<4x8xf32>
    %115 = arith.mulf %114, %113 : vector<4x8xf32>
    %cst_47 = arith.constant dense<0.000000e+00> : vector<4x32xf32>
    %116 = tpu.matmul %84, %7, %cst_47 {dimension_numbers = #tpu.dot_dimension_numbers<[1], [0], [0], [1], [0, 0, 1, 1], [], []>} : vector<4x8xf32>, vector<8x32xf32>, vector<4x32xf32> -> vector<4x32xf32>
    %117 = vector.broadcast %61 : vector<1x32xf32> to vector<4x32xf32>
    %118 = arith.addf %117, %116 : vector<4x32xf32>
    %119 = arith.truncf %118 : vector<4x32xf32> to vector<4x32xbf16>
    %cst_48 = arith.constant dense<0.000000e+00> : vector<4x192xf32>
    %120 = tpu.matmul %119, %16, %cst_48 {dimension_numbers = #tpu.dot_dimension_numbers<[1], [0], [0], [1], [0, 0, 1, 1], [], []>} : vector<4x32xbf16>, vector<32x192xbf16>, vector<4x192xf32> -> vector<4x192xf32>
    %121 = vector.broadcast %18 : vector<1x192xf32> to vector<4x192xf32>
    %122 = arith.addf %120, %121 : vector<4x192xf32>
    %123 = arith.truncf %122 : vector<4x192xf32> to vector<4x192xbf16>
    %c0_49 = arith.constant 0 : index
    %c0_50 = arith.constant 0 : index
    %c0_51 = arith.constant 0 : index
    %124 = vector.load %arg7[%c0_49, %c0_50, %c0_51] : memref<1x4x192xbf16, #tpu.memory_space<vmem>>, vector<1x4x192xbf16>
    %125 = vector.shape_cast %124 : vector<1x4x192xbf16> to vector<4x192xbf16>
    %126 = vector.shape_cast %123 : vector<4x192xbf16> to vector<1x4x192xbf16>
    tpu.vector_store %arg7[%c0_49, %c0_50, %c0_51], %126 {strides = array<i32>} : memref<1x4x192xbf16, #tpu.memory_space<vmem>>, vector<1x4x192xbf16>,
    %c0_i32 = arith.constant 0 : i32
    %127 = arith.cmpi eq, %arg1, %c0_i32 : i32
    %128 = arith.extui %127 : i1 to i32
    %c0_i32_52 = arith.constant 0 : i32
    %129 = arith.cmpi ne, %128, %c0_i32_52 : i32
    scf.if %129 {
      %cst_73 = arith.constant 0.000000e+00 : f32
      %184 = vector.broadcast %cst_73 : f32 to vector<8x128xf32>
      %c0_74 = arith.constant 0 : index
      %c0_75 = arith.constant 0 : index
      %c0_76 = arith.constant 0 : index
      %185 = vector.load %arg8[%c0_74, %c0_75, %c0_76] : memref<1x8x128xf32, #tpu.memory_space<vmem>>, vector<1x8x128xf32>
      %186 = vector.shape_cast %185 : vector<1x8x128xf32> to vector<8x128xf32>
      %187 = vector.shape_cast %184 : vector<8x128xf32> to vector<1x8x128xf32>
      tpu.vector_store %arg8[%c0_74, %c0_75, %c0_76], %187 {strides = array<i32>} : memref<1x8x128xf32, #tpu.memory_space<vmem>>, vector<1x8x128xf32>,
    } else {
    }
    %130 = arith.extf %63 : vector<4x192xbf16> to vector<4x192xf32>
    %cst_53 = arith.constant 2.000000e+00 : f32
    %131 = vector.broadcast %cst_53 : f32 to vector<4x192xf32>
    %132 = arith.mulf %131, %130 : vector<4x192xf32>
    %cst_54 = arith.constant 1.000000e+00 : f32
    %133 = vector.broadcast %cst_54 : f32 to vector<4x192xf32>
    %134 = arith.subf %132, %133 : vector<4x192xf32>
    %135 = arith.subf %122, %134 : vector<4x192xf32>
    %cst_55 = arith.constant -1.000000e+00 : f32
    %cst_56 = arith.constant 1.000000e+00 : f32
    %136 = vector.broadcast %cst_55 : f32 to vector<4x192xf32>
    %137 = arith.maximumf %136, %122 : vector<4x192xf32>
    %138 = vector.broadcast %cst_56 : f32 to vector<4x192xf32>
    %139 = arith.minimumf %138, %137 : vector<4x192xf32>
    %140 = arith.subf %139, %134 : vector<4x192xf32>
    %cst_57 = arith.constant 5.000000e-01 : f32
    %141 = vector.broadcast %cst_57 : f32 to vector<4x192xf32>
    %142 = arith.mulf %141, %140 : vector<4x192xf32>
    %143 = vector.shape_cast %115 : vector<4x8xf32> to vector<1x4x8xf32>
    %cst_58 = arith.constant dense<0.000000e+00> : vector<1xf32>
    %144 = vector.multi_reduction <add>, %143, %cst_58 [1, 2] : vector<1x4x8xf32> to vector<1xf32>
    %145 = vector.shape_cast %144 : vector<1xf32> to vector<1x1x1xf32>
    %146 = vector.extract %145[0, 0, 0] : f32 from vector<1x1x1xf32>
    %147 = arith.mulf %135, %135 : vector<4x192xf32>
    %148 = vector.shape_cast %147 : vector<4x192xf32> to vector<1x4x192xf32>
    %cst_59 = arith.constant dense<0.000000e+00> : vector<1xf32>
    %149 = vector.multi_reduction <add>, %148, %cst_59 [1, 2] : vector<1x4x192xf32> to vector<1xf32>
    %150 = vector.shape_cast %149 : vector<1xf32> to vector<1x1x1xf32>
    %151 = vector.extract %150[0, 0, 0] : f32 from vector<1x1x1xf32>
    %152 = arith.mulf %142, %142 : vector<4x192xf32>
    %153 = vector.shape_cast %152 : vector<4x192xf32> to vector<1x4x192xf32>
    %cst_60 = arith.constant dense<0.000000e+00> : vector<1xf32>
    %154 = vector.multi_reduction <add>, %153, %cst_60 [1, 2] : vector<1x4x192xf32> to vector<1xf32>
    %155 = vector.shape_cast %154 : vector<1xf32> to vector<1x1x1xf32>
    %156 = vector.extract %155[0, 0, 0] : f32 from vector<1x1x1xf32>
    %157 = tpu.iota {dimensions = array<i32: 1>} : vector<8x128xi32>
    %c0_i32_61 = arith.constant 0 : i32
    %158 = vector.broadcast %c0_i32_61 : i32 to vector<8x128xi32>
    %159 = arith.cmpi eq, %157, %158 : vector<8x128xi32>
    %cst_62 = arith.constant 0.000000e+00 : f32
    %160 = vector.broadcast %146 : f32 to vector<8x128xf32>
    %161 = vector.broadcast %cst_62 : f32 to vector<8x128xf32>
    %162 = arith.select %159, %160, %161 : vector<8x128xi1>, vector<8x128xf32>
    %c1_i32 = arith.constant 1 : i32
    %163 = vector.broadcast %c1_i32 : i32 to vector<8x128xi32>
    %164 = arith.cmpi eq, %157, %163 : vector<8x128xi32>
    %cst_63 = arith.constant 0.000000e+00 : f32
    %165 = vector.broadcast %151 : f32 to vector<8x128xf32>
    %166 = vector.broadcast %cst_63 : f32 to vector<8x128xf32>
    %167 = arith.select %164, %165, %166 : vector<8x128xi1>, vector<8x128xf32>
    %168 = arith.addf %162, %167 : vector<8x128xf32>
    %c2_i32 = arith.constant 2 : i32
    %169 = vector.broadcast %c2_i32 : i32 to vector<8x128xi32>
    %170 = arith.cmpi eq, %157, %169 : vector<8x128xi32>
    %cst_64 = arith.constant 0.000000e+00 : f32
    %171 = vector.broadcast %156 : f32 to vector<8x128xf32>
    %172 = vector.broadcast %cst_64 : f32 to vector<8x128xf32>
    %173 = arith.select %170, %171, %172 : vector<8x128xi1>, vector<8x128xf32>
    %174 = arith.addf %168, %173 : vector<8x128xf32>
    %c0_65 = arith.constant 0 : index
    %c0_66 = arith.constant 0 : index
    %c0_67 = arith.constant 0 : index
    %175 = vector.load %arg8[%c0_65, %c0_66, %c0_67] : memref<1x8x128xf32, #tpu.memory_space<vmem>>, vector<1x8x128xf32>
    %176 = vector.shape_cast %175 : vector<1x8x128xf32> to vector<8x128xf32>
    %177 = arith.addf %176, %174 : vector<8x128xf32>
    %c0_68 = arith.constant 0 : index
    %c0_69 = arith.constant 0 : index
    %c0_70 = arith.constant 0 : index
    %178 = vector.load %arg8[%c0_68, %c0_69, %c0_70] : memref<1x8x128xf32, #tpu.memory_space<vmem>>, vector<1x8x128xf32>
    %179 = vector.shape_cast %178 : vector<1x8x128xf32> to vector<8x128xf32>
    %180 = vector.shape_cast %177 : vector<8x128xf32> to vector<1x8x128xf32>
    tpu.vector_store %arg8[%c0_68, %c0_69, %c0_70], %180 {strides = array<i32>} : memref<1x8x128xf32, #tpu.memory_space<vmem>>, vector<1x8x128xf32>,
    %c0_i32_71 = arith.constant 0 : i32
    %181 = arith.cmpi eq, %arg1, %c0_i32_71 : i32
    %182 = arith.extui %181 : i1 to i32
    %c0_i32_72 = arith.constant 0 : i32
    %183 = arith.cmpi ne, %182, %c0_i32_72 : i32
    scf.if %183 {
      %c0_73 = arith.constant 0 : index
      %c0_74 = arith.constant 0 : index
      %c0_75 = arith.constant 0 : index
      %184 = vector.load %arg8[%c0_73, %c0_74, %c0_75] : memref<1x8x128xf32, #tpu.memory_space<vmem>>, vector<1x8x128xf32>
      %185 = vector.shape_cast %184 : vector<1x8x128xf32> to vector<8x128xf32>
      %186 = vector.extract_strided_slice %185 {offsets = [0, 0], sizes = [8, 1], strides = [1, 1]} : vector<8x128xf32> to vector<8x1xf32>
      %cst_76 = arith.constant 0.00563552743 : f32
      %187 = vector.broadcast %cst_76 : f32 to vector<8x1xf32>
      %188 = arith.mulf %186, %187 : vector<8x1xf32>
      %189 = vector.extract_strided_slice %185 {offsets = [0, 1], sizes = [8, 1], strides = [1, 1]} : vector<8x128xf32> to vector<8x1xf32>
      %cst_77 = arith.constant 0.00130208337 : f32
      %190 = vector.broadcast %cst_77 : f32 to vector<8x1xf32>
      %191 = arith.mulf %189, %190 : vector<8x1xf32>
      %192 = vector.extract_strided_slice %185 {offsets = [0, 2], sizes = [8, 1], strides = [1, 1]} : vector<8x128xf32> to vector<8x1xf32>
      %cst_78 = arith.constant 0.00130208337 : f32
      %193 = vector.broadcast %cst_78 : f32 to vector<8x1xf32>
      %194 = arith.mulf %192, %193 : vector<8x1xf32>
      %195 = vector.broadcast %22 : vector<1x1xf32> to vector<8x1xf32>
      %196 = arith.mulf %195, %191 : vector<8x1xf32>
      %197 = arith.addf %188, %196 : vector<8x1xf32>
      %c0_i32_79 = arith.constant 0 : i32
      %198 = vector.broadcast %c0_i32_79 : i32 to vector<8x128xi32>
      %199 = arith.cmpi eq, %157, %198 : vector<8x128xi32>
      %cst_80 = arith.constant 0.000000e+00 : f32
      %200 = vector.shape_cast %197 : vector<8x1xf32> to vector<8x1xf32>
      %201 = vector.broadcast %200 : vector<8x1xf32> to vector<8x128xf32>
      %202 = vector.broadcast %cst_80 : f32 to vector<8x128xf32>
      %203 = arith.select %199, %201, %202 : vector<8x128xi1>, vector<8x128xf32>
      %c1_i32_81 = arith.constant 1 : i32
      %204 = vector.broadcast %c1_i32_81 : i32 to vector<8x128xi32>
      %205 = arith.cmpi eq, %157, %204 : vector<8x128xi32>
      %cst_82 = arith.constant 0.000000e+00 : f32
      %206 = vector.shape_cast %188 : vector<8x1xf32> to vector<8x1xf32>
      %207 = vector.broadcast %206 : vector<8x1xf32> to vector<8x128xf32>
      %208 = vector.broadcast %cst_82 : f32 to vector<8x128xf32>
      %209 = arith.select %205, %207, %208 : vector<8x128xi1>, vector<8x128xf32>
      %210 = arith.addf %203, %209 : vector<8x128xf32>
      %c2_i32_83 = arith.constant 2 : i32
      %211 = vector.broadcast %c2_i32_83 : i32 to vector<8x128xi32>
      %212 = arith.cmpi eq, %157, %211 : vector<8x128xi32>
      %cst_84 = arith.constant 0.000000e+00 : f32
      %213 = vector.shape_cast %191 : vector<8x1xf32> to vector<8x1xf32>
      %214 = vector.broadcast %213 : vector<8x1xf32> to vector<8x128xf32>
      %215 = vector.broadcast %cst_84 : f32 to vector<8x128xf32>
      %216 = arith.select %212, %214, %215 : vector<8x128xi1>, vector<8x128xf32>
      %217 = arith.addf %210, %216 : vector<8x128xf32>
      %c3_i32 = arith.constant 3 : i32
      %218 = vector.broadcast %c3_i32 : i32 to vector<8x128xi32>
      %219 = arith.cmpi eq, %157, %218 : vector<8x128xi32>
      %cst_85 = arith.constant 0.000000e+00 : f32
      %220 = vector.shape_cast %194 : vector<8x1xf32> to vector<8x1xf32>
      %221 = vector.broadcast %220 : vector<8x1xf32> to vector<8x128xf32>
      %222 = vector.broadcast %cst_85 : f32 to vector<8x128xf32>
      %223 = arith.select %219, %221, %222 : vector<8x128xi1>, vector<8x128xf32>
      %224 = arith.addf %217, %223 : vector<8x128xf32>
      %c0_86 = arith.constant 0 : index
      %c0_87 = arith.constant 0 : index
      %c0_88 = arith.constant 0 : index
      %225 = vector.load %arg8[%c0_86, %c0_87, %c0_88] : memref<1x8x128xf32, #tpu.memory_space<vmem>>, vector<1x8x128xf32>
      %226 = vector.shape_cast %225 : vector<1x8x128xf32> to vector<8x128xf32>
      %227 = vector.shape_cast %224 : vector<8x128xf32> to vector<1x8x128xf32>
      tpu.vector_store %arg8[%c0_86, %c0_87, %c0_88], %227 {strides = array<i32>} : memref<1x8x128xf32, #tpu.memory_space<vmem>>, vector<1x8x128xf32>,
    } else {
    }
    return
  }
  func.func @transform_0(%arg0: i32, %arg1: i32) -> (i32, i32, i32) {
    %c0_i32 = arith.constant 0 : i32
    %c0_i32_0 = arith.constant 0 : i32
    %c0_i32_1 = arith.constant 0 : i32
    return %arg0, %c0_i32, %c0_i32_0 : i32, i32, i32
  }
  func.func @transform_1(%arg0: i32, %arg1: i32) -> (i32, i32, i32) {
    %c0_i32 = arith.constant 0 : i32
    %c0_i32_0 = arith.constant 0 : i32
    return %arg0, %arg1, %c0_i32 : i32, i32, i32
  }
  func.func @transform_2(%arg0: i32, %arg1: i32) -> (i32, i32) {
    %c0_i32 = arith.constant 0 : i32
    %c0_i32_0 = arith.constant 0 : i32
    %c0_i32_1 = arith.constant 0 : i32
    return %c0_i32, %c0_i32_0 : i32, i32
  }
  func.func @transform_3(%arg0: i32, %arg1: i32) -> (i32, i32) {
    %c0_i32 = arith.constant 0 : i32
    %c0_i32_0 = arith.constant 0 : i32
    %c0_i32_1 = arith.constant 0 : i32
    return %c0_i32, %c0_i32_0 : i32, i32
  }
  func.func @transform_4(%arg0: i32, %arg1: i32) -> (i32, i32) {
    %c0_i32 = arith.constant 0 : i32
    %c0_i32_0 = arith.constant 0 : i32
    %c0_i32_1 = arith.constant 0 : i32
    return %c0_i32, %c0_i32_0 : i32, i32
  }
  func.func @transform_5(%arg0: i32, %arg1: i32) -> (i32, i32, i32) {
    %c0_i32 = arith.constant 0 : i32
    %c0_i32_0 = arith.constant 0 : i32
    return %arg0, %arg1, %c0_i32 : i32, i32, i32
  }
  func.func @transform_6(%arg0: i32, %arg1: i32) -> (i32, i32, i32) {
    %c0_i32 = arith.constant 0 : i32
    %c0_i32_0 = arith.constant 0 : i32
    %c0_i32_1 = arith.constant 0 : i32
    return %arg0, %c0_i32, %c0_i32_0 : i32, i32, i32
  }
}

</mosaic_0001>

<bundles_post_ra>
// kernel: variable_rate_lossy_vae_forward.1
= control target key start
LH: loop header
LB: loop body
LE: loop exit
PB: predicated region body
PF: predicated region fallthrough
CT: control target
= control target key end

     0   :  { %s1884_s21 = smov 0   ;;  %s1886_s22 = smov 0   ;;  %s2172_s0 = inlined_call_operand.vmem [shape: f32[2,1,128], index: 0, kind: input, shape index: {}]   ;;  %s2173_s1 = inlined_call_operand.vmem [shape: bf16[2,4,192], index: 1, kind: input, shape index: {}]   ;;  %s2174_s2 = inlined_call_operand.vmem [shape: f32[224,32], index: 2, kind: input, shape index: {}]   ;;  %s2175_s3 = inlined_call_operand.vmem [shape: bf16[192,32], index: 3, kind: input, shape index: {}]   ;;  %s2176_s4 = inlined_call_operand.vmem [shape: bf16[40,192], index: 4, kind: input, shape index: {}]   ;;  %s2177_s5 = inlined_call_operand.vmem [shape: bf16[2,4,192], index: 5, kind: output, shape index: {0}]   ;;  %s2178_s6 = inlined_call_operand.vmem [shape: f32[2,8,128], index: 6, kind: output, shape index: {1}]  }
   0x1   :  { %s1888_s23 = smov 0  }
   0x2 LB: > { %s29_s24 = sadd.s32 1, %s1831_s22  ;;  %p1540_p0 = scmp.ge.s32.totalorder %s1835_s23, 1  ;;  %s1835_s23 = sphi %s1888_s23, %s17_s23   ;;  %s1831_s22 = sphi %s1886_s22, %s2180_s22   ;;  %s1827_s21 = sphi %s1884_s21, %s2179_s21  }
   0x3   : > { %p31_p1 = scmp.ge.s32.totalorder %s29_s24, 2  ;;  %p243_p2 = scmp.lt.s32.totalorder %s1835_s23, 3 }
   0x5   : > { %s2182_s24 = smov (%p31_p1, %s29_s24), 0  ;;  %p244_p3 = pnand %p1540_p0, %p243_p2 }
   0x6   : > { %v314_v0 = vld [vmem:[%s2174_s2] sm:$0xff] (!%p244_p3)  ;;  %v315_v1 = vld [vmem:[%s2174_s2 + $0x8] sm:$0xff] (!%p244_p3)  ;;  %p288_p4 = scmp.lt.s32.totalorder (!%p244_p3), %s1827_s21, 1  ;;  %v1837_v2 = vmov (!%p244_p3), 0.0|0.0   ;;  %vm1838_vm0 = vmmov (!%p244_p3), 0   ;;  %v1839_v4 = vmov (!%p244_p3), 0.0   ;;  %v847_v50 = vlaneseq (!%p244_p3) }
   0x7   : > { %247 = sbr.rel (%p244_p3) target bundleno = 2261 (0x8d5), region = 40  ;;  %1695 = vmatprep.subr.bf16.mxu1 (!%p244_p3), %v1837_v2  ;;  %v1696_v3 = vpack.c.bf16 (!%p244_p3), %v315_v1, %v314_v0  ;;  %1621 = vmatprep.mubr.msk.f32.mxu1 (!%p244_p3), %vm1838_vm0, %v1839_v4  ;;  %vm350_vm1 = vcmask (!%p244_p3), 130048   ;;  %v316_v6 = vld [vmem:[%s2174_s2 + $0x10] sm:$0xff] (!%p244_p3)  ;;  %v317_v7 = vld [vmem:[%s2174_s2 + $0x18] sm:$0xff] (!%p244_p3)  ;;  %v318_v9 = vld [vmem:[%s2174_s2 + $0x20] sm:$0xff] (!%p244_p3)  ;;  %vm436_vm2 = vcmask (!%p244_p3), 261120  }
   0x8   : > { %1716 = vmatprep.subr.bf16.mxu0 (!%p244_p3), %v1837_v2  ;;  %1665 = vmatprep.mubr.msk.f32.mxu0 (!%p244_p3), %vm1838_vm0, %v1839_v4  ;;  %v1699_v8 = vpack.c.bf16 (!%p244_p3), %v317_v7, %v316_v6  ;;  %v319_v10 = vld [vmem:[%s2174_s2 + $0x28] sm:$0xff] (!%p244_p3)  ;;  %v1943_v12 = vld [vmem:[%s2174_s2 + $0xd8] sm:$0xff] (!%p244_p3)  ;;  %v320_v23 = vld [vmem:[%s2174_s2 + $0x30] sm:$0xff] (!%p244_p3)  ;;  %v1840_v47 = vmov (!%p244_p3), 0   ;;  %v1841_v48 = vmov (!%p244_p3), 1983009808  }
   0x9   : > { %1697 = vmatpush3.bf16.msra.mxu1 (!%p244_p3), %v1696_v3  ;;  %v1702_v11 = vpack.c.bf16 (!%p244_p3), %v319_v10, %v318_v9  ;;  %v321_v24 = vld [vmem:[%s2174_s2 + $0x38] sm:$0xff] (!%p244_p3)  ;;  %v322_v28 = vld [vmem:[%s2174_s2 + $0x40] sm:$0xff] (!%p244_p3)  ;;  %v323_v29 = vld [vmem:[%s2174_s2 + $0x48] sm:$0xff] (!%p244_p3)  ;;  %v434_v31 = vrot.slane (!%p244_p3), %v1943_v12, 1  ;;  %1776 = vset.pattern.permute.xlu0 (!%p244_p3), %v1840_v47  ;;  %v853_v49 = vunpack.c.l.s4 (!%p244_p3), %v1841_v48  ;;  %v2008_v54 = vshrl.u32 (!%p244_p3), %v847_v50, 7  ;;  %s1842_s10 = smov (!%p244_p3), 112  }
   0xa   : > { %1698 = vmatprep.subr.bf16.mxu1 (!%p244_p3), %v1837_v2  ;;  %v1705_v26 = vpack.c.bf16 (!%p244_p3), %v321_v24, %v320_v23  ;;  %v1708_v30 = vpack.c.bf16 (!%p244_p3), %v323_v29, %v322_v28  ;;  %v324_v32 = vld [vmem:[%s2174_s2 + $0x50] sm:$0xff] (!%p244_p3)  ;;  %v325_v33 = vld [vmem:[%s2174_s2 + $0x58] sm:$0xff] (!%p244_p3)  ;;  %v326_v38 = vld [vmem:[%s2174_s2 + $0x60] sm:$0xff] (!%p244_p3)  ;;  %vm933_vm3 = vcmask (!%p244_p3), 523264   ;;  %vm1106_vm4 = vcmask (!%p244_p3), 64512   ;;  %s1843_s15 = smov (!%p244_p3), 16  }
   0xb   : > { %v1711_v35 = vpack.c.bf16 (!%p244_p3), %v325_v33, %v324_v32  ;;  %v327_v39 = vld [vmem:[%s2174_s2 + $0x68] sm:$0xff] (!%p244_p3)  ;;  %v328_v41 = vld [vmem:[%s2174_s2 + $0x70] sm:$0xff] (!%p244_p3)  ;;  %v329_v42 = vld [vmem:[%s2174_s2 + $0x78] sm:$0xff] (!%p244_p3)  ;;  %v854_v52 = vunpack.c.0.s8 (!%p244_p3), %v853_v49  ;;  %s1844_s20 = smov (!%p244_p3), 8   ;;  %s1845_s25 = smov (!%p244_p3), 104   ;;  %vm1270_vm5 = vcmask (!%p244_p3), 1041408  }
   0xc   : > { %v1714_v40 = vpack.c.bf16 (!%p244_p3), %v327_v39, %v326_v38  ;;  %v1717_v43 = vpack.c.bf16 (!%p244_p3), %v329_v42, %v328_v41  ;;  %v330_v44 = vld [vmem:[%s2174_s2 + $0x80] sm:$0xff] (!%p244_p3)  ;;  %v331_v45 = vld [vmem:[%s2174_s2 + $0x88] sm:$0xff] (!%p244_p3)  ;;  %v1783_v3 = vld [vmem:[%s2175_s3 + $0x10] sm:$0xff] (!%p244_p3)   ;;  %v510_v41 = vrot.slane (!%p244_p3), %v1943_v12, 2  ;;  %vm1271_vm6 = vcmask (!%p244_p3), 519170   ;;  %s1847_s11 = smov (!%p244_p3), 15  }
   0xd   : > { %v1720_v46 = vpack.c.bf16 (!%p244_p3), %v331_v45, %v330_v44  ;;  %v2011_v55 = vsub.s32 (!%p244_p3), %v854_v52, %v2008_v54  ;;  %v1781_v62 = vld [vmem:[%s2175_s3] sm:$0xff] (!%p244_p3)   ;;  %v1782_v1 = vld [vmem:[%s2175_s3 + $0x8] sm:$0xff] (!%p244_p3)   ;;  %v1784_v6 = vld [vmem:[%s2175_s3 + $0x18] sm:$0xff] (!%p244_p3)   ;;  %vm1312_vm7 = vcmask (!%p244_p3), 1043456   ;;  %vm1314_vm9 = vcmask (!%p244_p3), 519168  }
   0xe   : > { %s2184_s21 = smov (!%p288_p4, %s1827_s21), 1  ;;  %1718 = vmatpush3.bf16.msra.mxu0 %v1717_v43  ;;  %v1785_v7 = vld [vmem:[%s2175_s3 + $0x20] sm:$0xff]   ;;  %v1787_v9 = vld [vmem:[%s2175_s3 + $0x30] sm:$0xff]   ;;  %v1788_v10 = vld [vmem:[%s2175_s3 + $0x38] sm:$0xff]   ;;  %v2104_v43 = vsub.s32 0, %v2008_v54  ;;  %vm1299_vm10 = vcmask 60416  }
   0xf   : > { %s290_s7 = scalar_lea.vmem %s2172_s0, %s2184_s21  ;;  %1719 = vmatprep.subr.bf16.mxu0 %v1837_v2  ;;  %s1580_s26 = sshll.u32 %s2184_s21, 2  ;;  %v336_v33 = vld [vmem:[%s2174_s2 + $0xb0] sm:$0xff]  ;;  %v338_v38 = vld [vmem:[%s2174_s2 + $0xc0] sm:$0xff]  ;;  %v339_v39 = vld [vmem:[%s2174_s2 + $0xc8] sm:$0xff] }
  0x10   : > { %v1921_v5 = vld [vmem:[%s290_s7] sm:$0x1]  ;;  %s299_s29 = scalar_lea.vmem %s2173_s1, %s1580_s26  ;;  %v340_v54 = vld [vmem:[%s2174_s2 + $0xd0] sm:$0xff]  ;;  %s308_s7 = scalar_lea.vmem %s2177_s5, %s1580_s26  ;;  %vm1272_vm8 = vmor %vm1271_vm6, %vm1270_vm5 }
  0x11   : > { %1622 = vmatmul.mubr.msk.f32.vlgmr.msra.gmra.mrb[0].mxu1 %vm350_vm1, %v1921_v5  ;;  %v2013_v56 = vld [vmem:[%s299_s29] sm:$0xf]  ;;  %s1545_s12 = sshll.u32 %s2184_s21, 3 }
  0x12   : > { %1632 = vmatprep.mubr.msk.f32.mxu1 %vm1838_vm0, %v1839_v4  ;;  %1700 = vmatpush3.bf16.msra.mxu1 %v1699_v8  ;;  %v858_v58 = vrot.slane %v2013_v56, %v2011_v55  ;;  %v1786_v8 = vld [vmem:[%s2175_s3 + $0x28] sm:$0xff]   ;;  %s312_s14 = scalar_lea.vmem %s2178_s6, %s1545_s12 }
  0x13   : > { %1701 = vmatprep.subr.bf16.mxu1 %v1837_v2  ;;  %1721 = vmatpush3.bf16.msra.mxu0 %v1720_v46 }
  0x14   : > { %937 = vmatprep.subr.bf16.mxu0 %v1840_v47  ;;  %v859_v63 = vcombine.high %v858_v58, %v858_v58 }
  0x16   : > { %1703 = vmatpush3.bf16.msra.mxu1 %v1702_v11  ;;  %v1789_v11 = vld [vmem:[%s2175_s3 + $0x40] sm:$0xff]  }
  0x17   : > { %1704 = vmatprep.subr.bf16.mxu1 %v1837_v2 }
  0xe4   : > { %v420_v13 = vpop.f32.mrb[0].mxu1 }
  0xe5   : > { %v421_v14 = vadd.f32 %v420_v13, %v1943_v12  ;;  %v1623_v15 = vpop.f32.mrb[1].mxu1  ;;  %v1790_v13 = vld [vmem:[%s2175_s3 + $0x48] sm:$0xff]  }
  0xe6   : > { %v1792_v15 = vld [vmem:[%s2175_s3 + $0x58] sm:$0xff]  }
  0xe7   : > { %v424_v16 = vmul.f32 %v421_v14, %v421_v14 }
  0xe9   : > { %v425_v17 = vmul.f32 %v424_v16, %v421_v14  ;;  %v332_v16 = vld [vmem:[%s2174_s2 + $0x90] sm:$0xff] }
  0xeb   : > { %v426_v18 = vmul.f32 0.044715, %v425_v17  ;;  %v333_v17 = vld [vmem:[%s2174_s2 + $0x98] sm:$0xff] }
  0xed   : > { %v427_v19 = vadd.f32 %v426_v18, %v421_v14  ;;  %v1723_v18 = vpack.c.bf16 %v333_v17, %v332_v16 }
  0xef   : > { %v428_v20 = vmul.f32 0.7978846, %v427_v19  ;;  %v334_v19 = vld [vmem:[%s2174_s2 + $0xa0] sm:$0xff] }
  0xf1   : > { %1799 = vtanh.f32 %v428_v20  ;;  %v335_v20 = vld [vmem:[%s2174_s2 + $0xa8] sm:$0xff] }
  0xfb   : > { %v1800_v21 = vpop.eup %1799 }
  0xfc   : > { %v430_v22 = vadd.f32 1.0, %v1800_v21  ;;  %v1726_v21 = vpack.c.bf16 %v335_v20, %v334_v19 }
  0xfe   : > { %v431_v25 = vmul.f32 0.5, %v430_v22  ;;  %v661_v22 = vrot.slane %v1943_v12, 4 }
 0x100   : > { %v432_v27 = vmul.f32 %v431_v25, %v421_v14  ;;  %v1791_v14 = vld [vmem:[%s2175_s3 + $0x50] sm:$0xff]  }
 0x102   : > { %1633 = vmatmul.mubr.msk.f32.vlgmr.msra.gmra.mrb[2].mxu1 %vm436_vm2, %v432_v27 }
 0x103   : > { %1706 = vmatpush3.bf16.msra.mxu1 %v1705_v26  ;;  %1643 = vmatprep.mubr.msk.f32.mxu1 %vm1838_vm0, %v1839_v4 }
 0x104   : > { %1707 = vmatprep.subr.bf16.mxu1 %v1837_v2 }
 0x107   : > { %1709 = vmatpush3.bf16.msra.mxu1 %v1708_v30 }
 0x108   : > { %1710 = vmatprep.subr.bf16.mxu1 %v1837_v2 }
 0x1d5   : > { %v506_v34 = vpop.f32.mrb[2].mxu1 }
 0x1d6   : > { %v507_v36 = vadd.f32 %v506_v34, %v434_v31  ;;  %v1634_v37 = vpop.f32.mrb[3].mxu1  ;;  %v337_v34 = vld [vmem:[%s2174_s2 + $0xb8] sm:$0xff] }
 0x1d8   : > { %1644 = vmatmul.mubr.msk.f32.vlgmr.msra.gmra.mrb[4].mxu1 %vm436_vm2, %v507_v36 }
 0x1d9   : > { %1712 = vmatpush3.bf16.msra.mxu1 %v1711_v35  ;;  %1654 = vmatprep.mubr.msk.f32.mxu1 %vm1838_vm0, %v1839_v4 }
 0x1da   : > { %1713 = vmatprep.subr.bf16.mxu1 %v1837_v2 }
 0x1dd   : > { %1715 = vmatpush3.bf16.msra.mxu1 %v1714_v40  ;;  %v1732_v40 = vpack.c.bf16 %v339_v39, %v338_v38 }
 0x1de   : > { %1722 = vmatprep.subr.bf16.mxu1 %v1837_v2 }
 0x1e0   : > { %1655 = vmatmul.mubr.msk.f32.vlgmr.msra.gmra.mrb[6].mxu1 %vm436_vm2, %v507_v36  ;;  %v1729_v36 = vpack.c.bf16 %v337_v34, %v336_v33 }
 0x1e1   : > { %1676 = vmatprep.mubr.msk.f32.mxu1 %vm1838_vm0, %v1839_v4  ;;  %1724 = vmatpush3.bf16.msra.mxu1 %v1723_v18 }
 0x1e2   : > { %1725 = vmatprep.subr.bf16.mxu1 %v1837_v2 }
 0x1e5   : > { %1727 = vmatpush3.bf16.msra.mxu1 %v1726_v21 }
 0x1e6   : > { %1728 = vmatprep.subr.bf16.mxu1 %v1837_v2 }
 0x2ab   : > { %v2000_v51 = vpop.f32.mrb[4].mxu1 }
 0x2ac   : > { %v1645_v53 = vpop.f32.mrb[5].mxu1  ;;  %v582_v42 = vadd.f32 %v2000_v51, %v510_v41 }
 0x2ae   : > { %v850_v44 = vrot.slane %v582_v42, %v2104_v43 }
 0x2b3   : > { %v651_v57 = vpop.f32.mrb[6].mxu1 }
 0x2b4   : > { %v656_v59 = vrot.slane %v651_v57, 5  ;;  %v1656_v60 = vpop.f32.mrb[7].mxu1 }
 0x2b6   : > { %v658_v61 = vadd.f32 %v656_v59, %v1943_v12 }
 0x2b8   : > { %v660_v0 = vrot.slane %v658_v61, 3 }
 0x2ba   : > { %1666 = vmatmul.mubr.msk.f32.vlgmr.msra.gmra.mrb[0].mxu0 %vm436_vm2, %v660_v0 }
 0x2bb   : > { %938 = vmatpush1.bf16.msra.mxu0 %v1781_v62  ;;  %1564 = vmatprep.mubr.msk.bf16.mxu0 %vm933_vm3, %v859_v63 }
 0x2bc   : > { %939 = vmatprep.subr.bf16.mxu0 %v1840_v47 }
 0x2bf   : > { %940 = vmatpush1.bf16.msra.mxu0 %v1782_v1  ;;  %v744_v1 = vrot.slane %v1943_v12, 5 }
 0x2c0   : > { %941 = vmatprep.subr.bf16.mxu0 %v1840_v47 }
 0x2c3   : > { %942 = vmatpush1.bf16.msra.mxu0 %v1783_v3 }
 0x2c4   : > { %943 = vmatprep.subr.bf16.mxu0 %v1840_v47 }
 0x2c7   : > { %944 = vmatpush1.bf16.msra.mxu0 %v1784_v6 }
 0x2c8   : > { %945 = vmatprep.subr.bf16.mxu0 %v1840_v47 }
 0x2cb   : > { %946 = vmatpush1.bf16.msra.mxu0 %v1785_v7 }
 0x2cc   : > { %947 = vmatprep.subr.bf16.mxu0 %v1840_v47 }
 0x2cf   : > { %948 = vmatpush1.bf16.msra.mxu0 %v1786_v8 }
 0x2d0   : > { %949 = vmatprep.subr.bf16.mxu0 %v1840_v47 }
 0x2d3   : > { %950 = vmatpush1.bf16.msra.mxu0 %v1787_v9 }
 0x2d4   : > { %951 = vmatprep.subr.bf16.mxu0 %v1840_v47 }
 0x2d7   : > { %952 = vmatpush1.bf16.msra.mxu0 %v1788_v10 }
 0x2d8   : > { %953 = vmatprep.subr.bf16.mxu0 %v1840_v47 }
 0x2db   : > { %954 = vmatpush1.bf16.msra.mxu0 %v1789_v11 }
 0x2dc   : > { %955 = vmatprep.subr.bf16.mxu0 %v1840_v47 }
 0x2df   : > { %956 = vmatpush1.bf16.msra.mxu0 %v1790_v13 }
 0x2e0   : > { %957 = vmatprep.subr.bf16.mxu0 %v1840_v47 }
 0x2e3   : > { %958 = vmatpush1.bf16.msra.mxu0 %v1791_v14 }
 0x2e4   : > { %959 = vmatprep.subr.bf16.mxu0 %v1840_v47 }
 0x2e7   : > { %960 = vmatpush1.bf16.msra.mxu0 %v1792_v15 }
 0x2ea   : > { %970 = vmatmul.mubr.bf16.vlgmr.msra.gmra.mrb[4].mxu0 %v858_v58 }
 0x38d   : > { %v731_v23 = vpop.f32.mrb[0].mxu0 }
 0x38e   : > { %v732_v24 = vadd.f32 %v731_v23, %v661_v22  ;;  %v1667_v25 = vpop.f32.mrb[1].mxu0  ;;  %v1793_v23 = vld [vmem:[%s2176_s4] ss:$8 sps:$4 sm:$0xff]  }
 0x390   : > { %v735_v26 = vmul.f32 %v732_v24, %v732_v24 }
 0x392   : > { %v736_v27 = vmul.f32 %v735_v26, %v732_v24  ;;  %v1798_v26 = vld [vmem:[%s2176_s4 + $0x14] ss:$8 sps:$4 sm:$0xff]  }
 0x394   : > { %v737_v28 = vmul.f32 0.044715, %v736_v27  ;;  %v1796_v27 = vld [vmem:[%s2176_s4 + $0x10] ss:$8 sps:$4 sm:$0xff]  }
 0x396   : > { %v738_v29 = vadd.f32 %v737_v28, %v732_v24 }
 0x398   : > { %v739_v30 = vmul.f32 0.7978846, %v738_v29 }
 0x39a   : > { %1801 = vtanh.f32 %v739_v30 }
 0x3a4   : > { %v1802_v31 = vpop.eup %1801 }
 0x3a5   : > { %v741_v32 = vadd.f32 1.0, %v1802_v31  ;;  %v819_v31 = vrot.slane %v1943_v12, 6 }
 0x3a7   : > { %v742_v35 = vmul.f32 0.5, %v741_v32 }
 0x3a9   : > { %v2087_v37 = vmul.f32 %v742_v35, %v732_v24  ;;  %v1795_v24 = vld [vmem:[%s2176_s4 + $0x4] ss:$8 sps:$4 sm:$0xff]  }
 0x3ab   : > { %1677 = vmatmul.mubr.msk.f32.vlgmr.msra.gmra.mrb[8].mxu1 %vm436_vm2, %v2087_v37  ;;  %v821_v32 = vadd.f32 %v819_v31, %v2087_v37 }
 0x3ac   : > { %1730 = vmatpush3.bf16.msra.mxu1 %v1729_v36  ;;  %1687 = vmatprep.mubr.msk.f32.mxu1 %vm1838_vm0, %v1839_v4 }
 0x3ad   : > { %1731 = vmatprep.subr.bf16.mxu1 %v1837_v2  ;;  %v1182_v33 = vrot.slane %v821_v32, %v2104_v43 }
 0x3b0   : > { %1733 = vmatpush3.bf16.msra.mxu1 %v1732_v40 }
 0x3b1   : > { %1690 = vmatprep.subr.mxu1 %v1839_v4 }
 0x3bd   : > { %v971_v45 = vpop.f32.mrb[4].mxu0 }
 0x3be   : > { %v972_v46 = vadd.f32 %v971_v45, %v850_v44  ;;  %v973_v48 = vpop.f32.mrb[5].mxu0 }
 0x3bf   : > { %v974_v49 = vpop.f32.mrb[6].mxu0 }
 0x3c0   : > { %v977_v52 = vmul.f32 %v972_v46, %v972_v46  ;;  %v975_v53 = vpop.f32.mrb[7].mxu0 }
 0x3c1   : > { %v1279_v53 = vunpack.c.l.bf16 %v2013_v56 }
 0x3c2   : > { %v978_v57 = vmul.f32 %v977_v52, %v972_v46 }
 0x3c4   : > { %v979_v2 = vmul.f32 0.044715, %v978_v57  ;;  %v346_v57 = vld [vmem:[%s2176_s4 + $0x20] sm:$0x11] }
 0x3c6   : > { %v980_v58 = vadd.f32 %v979_v2, %v972_v46  ;;  %v1280_v2 = vmul.f32 2.0, %v1279_v53 }
 0x3c8   : > { %v981_v59 = vmul.f32 0.7978846, %v980_v58  ;;  %v347_v58 = vunpack.c.l.bf16 %v346_v57 }
 0x3ca   : > { %1803 = vtanh.f32 %v981_v59  ;;  %v348_v59 = vunpack.c.h.bf16 %v346_v57 }
 0x3d4   : > { %v1804_v60 = vpop.eup %1803 }
 0x3d5   : > { %v983_v61 = vadd.f32 1.0, %v1804_v60  ;;  %v1575_v60 = vadd.f32 -1.0, %v1280_v2 }
 0x3d7   : > { %v984_v62 = vmul.f32 0.5, %v983_v61  ;;  %v1188_v61 = vrot.slane %v347_v58, %v2104_v43  ;;  %v1846_v58 = vmov 1  }
 0x3d8   : > { %1777 = vset.pattern.permute.xlu1 %v1846_v58 }
 0x3d9   : > { %v985_v51 = vmul.f32 %v984_v62, %v972_v46  ;;  %v1192_v62 = vrot.slane %v348_v59, %v2104_v43 }
 0x3db   : > { %1688 = vmatmul.mubr.msk.f32.vlgmr.msra.gmra.mrb[10].mxu1 %vm436_vm2, %v985_v51 }
 0x3dc   : > { %1692 = vmatprep.mubr.msk.f32.mxu1 %vm1838_vm0, %v1839_v4  ;;  %1691 = vmatpush3.msra.mxu1 %v340_v54  ;;  %v1283_v54 = vcombine.high %v1575_v60, %v1575_v60 }
 0x3dd   : > { %1216 = vmatprep.subr.bf16.mxu1 %v1795_v24 }
 0x47e   : > { %v815_v63 = vpop.f32.mrb[8].mxu1 }
 0x47f   : > { %v1678_v0 = vpop.f32.mrb[9].mxu1  ;;  %v816_v3 = vadd.f32 %v815_v63, %v744_v1 }
 0x481   : > { %v989_v6 = vrot.slane %v816_v3, %v2104_v43 }
 0x4ae   : > { %v1059_v7 = vpop.f32.mrb[10].mxu1 }
 0x4af   : > { %v1060_v8 = vadd.f32 %v1059_v7, %v989_v6  ;;  %v1689_v9 = vpop.f32.mrb[11].mxu1 }
 0x4b1   : > { %1081 = vrot.lane.b32.xlu0 %v1060_v8, %s1842_s10  ;;  %1693 = vmatmul.mubr.msk.f32.vlgmr.msra.gmra.mrb[12].mxu1 %vm1106_vm4, %v1060_v8  ;;  %v1063_v4 = vadd.f32 2.3, %v1060_v8  ;;  %v1079_v39 = vmul.f32 1.442695, %v1060_v8 }
 0x4b2   : > { %1248 = vmatprep.mubr.bf16.mxu1 %v1840_v47  ;;  %1217 = vmatpush1.bf16.msra.mxu1 %v1793_v23 }
 0x4b3   : > { %v1065_v10 = vand.u32 2147483647, %v1063_v4  ;;  %v1064_v17 = vmax.f32 %v1063_v4, 0.0  ;;  %1218 = vmatprep.subr.bf16.mxu1 %v1798_v26 }
 0x4b5   : > { %v1066_v11 = vsub.f32 0.0, %v1065_v10 }
 0x4b6   : > { %1219 = vmatpush1.bf16.msra.mxu1 %v1796_v27 }
 0x4b7   : > { %v1067_v13 = vmul.f32 1.442695, %v1066_v11 }
 0x4b9   : > { %1805 = vpow2.f32 %v1067_v13 }
 0x4c3   : > { %v1806_v14 = vpop.eup %1805 }
 0x4c4   : > { %v1069_v15 = vadd.f32 1.0, %v1806_v14 }
 0x4c6   : > { %1807 = vlog2.f32 %v1069_v15 }
 0x4d0   : > { %v1808_v16 = vpop.eup %1807 }
 0x4d1   : > { %v1071_v18 = vmul.f32 0.6931472, %v1808_v16 }
 0x4d3   : > { %v1072_v19 = vadd.f32 %v1071_v18, %v1064_v17 }
 0x4d5   : > { %v1566_v20 = vadd.f32 -2.3, %v1072_v19 }
 0x4d7   : > { %v1091_v21 = vsub.f32 0.0, %v1566_v20 }
 0x4d9   : > { %v1092_v22 = vmul.f32 1.442695, %v1091_v21 }
 0x4db   : > { %1809 = vpow2.f32 %v1092_v22 }
 0x4dc   : > { %1811 = vpow2.f32 %v1079_v39 }
 0x4e5   : > { %v1810_v25 = vpop.eup %1809 }
 0x4e6   : > { %1095 = vrot.lane.b32.xlu1 %v1810_v25, %s1842_s10  ;;  %v1812_v40 = vpop.eup %1811 }
 0x4ea   : > { %1075 = vrot.lane.b32.xlu1 %v1060_v8, %s1843_s15 }
 0x523   : > { %v1082_v28 = vpop.permute.xlu0 %1081 }
 0x524   : > { %v1084_v29 = vsub.f32 %v1060_v8, %v1082_v28 }
 0x526   : > { %v1085_v30 = vmul.f32 %v1084_v29, %v1084_v29 }
 0x528   : > { %1087 = vrot.lane.b32.xlu0 %v1085_v30, %s1844_s20 }
 0x558   : > { %v1096_v44 = vpop.permute.xlu1 %1095 }
 0x55c   : > { %v1076_v46 = vpop.permute.xlu1 %1075 }
 0x55d   : > { %v1078_v12 = vsub.f32 %v1566_v20, %v1076_v46 }
 0x584   : > { %v1175_v34 = vpop.f32.mrb[12].mxu1 }
 0x585   : > { %v1183_v35 = vadd.f32 %v1182_v33, %v1175_v34  ;;  %v1694_v36 = vpop.f32.mrb[13].mxu1 }
 0x587   : > { %v1184_v38 = vpack.c.bf16 %v1183_v35, %v1183_v35 }
 0x589   : > { %1573 = vmatmul.mubr.msk.bf16.vlgmr.msra.gmra.mrb[16].mxu1 %vm436_vm2, %v1184_v38 }
 0x59a   : > { %v1088_v41 = vpop.permute.xlu0 %1087 }
 0x59b   : > { %v1090_v42 = vadd.f32 %v1812_v40, %v1088_v41 }
 0x59d   : > { %v1098_v45 = vmul.f32 %v1096_v44, %v1090_v42 }
 0x59f   : > { %1100 = vrot.lane.b32.xlu0 %v1098_v45, %s1843_s15 }
 0x611   : > { %v1101_v48 = vpop.permute.xlu0 %1100 }
 0x612   : > { %v1103_v37 = vadd.f32 %v1101_v48, %v1078_v12 }
 0x614   : > { %v1567_v49 = vadd.f32 -1.0, %v1103_v37 }
 0x616   : > { %v1105_v52 = vmul.f32 0.5, %v1567_v49  ;;  %v1341_v49 = vand.u32 127, %v847_v50 }
 0x618   : > { %1296 = vrot.lane.b32.xlu1 %v1105_v52, %s1845_s25  ;;  %vm1342_vm11 = vcmp.eq.s32.totalorder %v1341_v49, 0  ;;  %vm1345_vm12 = vcmp.eq.s32.totalorder %v1341_v49, 1  ;;  %vm1349_vm13 = vcmp.eq.s32.totalorder %v1341_v49, 2  ;;  %vm1396_vm14 = vcmp.eq.s32.totalorder %v1341_v49, 3 }
 0x65c   : > { %v1250_v51 = vpop.f32.mrb[16].mxu1 }
 0x65d   : > { %v1251_v63 = vadd.f32 %v1250_v51, %v1188_v61  ;;  %v1252_v0 = vpop.f32.mrb[17].mxu1 }
 0x65e   : > { %v1253_v1 = vadd.f32 %v1252_v0, %v1192_v62  ;;  %v1254_v56 = vpop.f32.mrb[18].mxu1 }
 0x65f   : > { %v1576_v3 = vclamps-f32 %v1251_v63, 1.0  ;;  %v1255_v6 = vpop.f32.mrb[19].mxu1  ;;  %v1285_v7 = vsub.f32 %v1251_v63, %v1575_v60 }
 0x660   : > { %v1574_v8 = vpack.c.bf16 %v1253_v1, %v1251_v63  ;;  %v1577_v9 = vclamps-f32 %v1253_v1, 1.0  ;;  %v1286_v4 = vsub.f32 %v1253_v1, %v1283_v54  ;;  %v1365_v63 = vrot.slane %v1921_v5, %v2104_v43 }
 0x661   : > { %v1310_v10 = vmul.f32 %v1285_v7, %v1285_v7  ;;  %v1291_v11 = vsub.f32 %v1576_v3, %v1575_v60 }
 0x662   : > { %v1268_v13 = vrot.slane %v1574_v8, %v2011_v55  ;;  %v1311_v14 = vmul.f32 %v1286_v4, %v1286_v4  ;;  %v1292_v15 = vsub.f32 %v1577_v9, %v1283_v54  ;;  %v1848_v54 = vmov 2  }
 0x663   : > { %v1313_v16 = vsel %vm1312_vm7, %v1310_v10, 0.0  ;;  %v1293_v17 = vmul.f32 0.5, %v1291_v11 }
 0x664   : > { %1273 = vst.msk [vmem:[%s308_s7] sm:$0xf] %vm1272_vm8, %v1268_v13  ;;  %v1315_v18 = vsel %vm1314_vm9, %v1311_v14, 0.0  ;;  %v1294_v19 = vmul.f32 0.5, %v1292_v15 }
 0x665   : > { %v1316_v20 = vadd.f32 %v1315_v18, %v1313_v16  ;;  %v1326_v21 = vmul.f32 %v1293_v17, %v1293_v17 }
 0x666   : > { %v1327_v22 = vmul.f32 %v1294_v19, %v1294_v19 }
 0x667   : > { %1317 = vadd.xlane.f32.xlu1 %v1316_v20  ;;  %v1328_v23 = vsel %vm1312_vm7, %v1326_v21, 0.0 }
 0x668   : > { %v1329_v24 = vsel %vm1314_vm9, %v1327_v22, 0.0 }
 0x669   : > { %v1330_v25 = vadd.f32 %v1329_v24, %v1328_v23 }
 0x68a   : > { %v1297_v26 = vpop.permute.xlu1 %1296 }
 0x68b   : > { %v1300_v27 = vsel %vm1299_vm10, %v1297_v26, 0.0 }
 0x68c   : > { %1301 = vadd.xlane.f32.xlu0 %v1300_v27 }
 0x690   : > { %1331 = vadd.xlane.f32.xlu0 %v1330_v25 }
 0x6f4   : > { %v1318_v55 = vpop.xlane.xlu1 %1317 }
 0x6f5   : > { %v1319_v28 = vrot.slane %v1318_v55, 4 }
 0x6f7   : > { %v1320_v29 = vadd.f32 %v1319_v28, %v1318_v55 }
 0x6f9   : > { %v1321_v30 = vrot.slane %v1320_v29, 2 }
 0x6fb   : > { %v1322_v35 = vadd.f32 %v1321_v30, %v1320_v29 }
 0x6fd   : > { %v1323_v41 = vrot.slane %v1322_v35, 1 }
 0x6ff   : > { %v1324_v12 = vadd.f32 %v1323_v41, %v1322_v35 }
 0x719   : > { %v1302_v31 = vpop.xlane.xlu0 %1301 }
 0x71a   : > { %v1303_v32 = vrot.slane %v1302_v31, 4 }
 0x71c   : > { %v1304_v33 = vadd.f32 %v1303_v32, %v1302_v31 }
 0x71d   : > { %v1332_v34 = vpop.xlane.xlu0 %1331 }
 0x71e   : > { %v1305_v36 = vrot.slane %v1304_v33, 2  ;;  %v1333_v38 = vrot.slane %v1332_v34, 4 }
 0x720   : > { %v1334_v39 = vadd.f32 %v1333_v38, %v1332_v34  ;;  %v1306_v40 = vadd.f32 %v1305_v36, %v1304_v33 }
 0x722   : > { %v1335_v42 = vrot.slane %v1334_v39, 2  ;;  %v1307_v44 = vrot.slane %v1306_v40, 1 }
 0x724   : > { %v1308_v45 = vadd.f32 %v1307_v44, %v1306_v40  ;;  %v1336_v46 = vadd.f32 %v1335_v42, %v1334_v39 }
 0x726   : > { %1734 = vpush %v1308_v45  ;;  %v1337_v48 = vrot.slane %v1336_v46, 1 }
 0x727   : > { %1736 = vpush %v1324_v12 }
 0x728   : > { %v1338_v37 = vadd.f32 %v1337_v48, %v1336_v46 }
 0x72a   : > { %1738 = vpush %v1338_v37 }
 0x757   : > { %s1735_s26 = spop %1734 }
 0x758   : > { %v1343_v52 = vstv %s1735_s26  ;;  %s1737_s8 = spop %1736 }
 0x759   : > { %v1344_v53 = vsel %vm1342_vm11, %v1343_v52, 0.0  ;;  %v1346_v57 = vstv %s1737_s8 }
 0x75a   : > { %v1347_v2 = vsel %vm1345_vm12, %v1346_v57, 0.0 }
 0x75b   : > { %s1739_s9 = spop %1738  ;;  %v1348_v59 = vadd.f32 %v1347_v2, %v1344_v53 }
 0x75c   : > { %v1350_v60 = vstv %s1739_s9 }
 0x75d   : > { %v1351_v61 = vsel %vm1349_vm13, %v1350_v60, 0.0 }
 0x75e   : > { %v1352_v62 = vadd.f32 %v1351_v61, %v1348_v59 }
 0x760   : > { %v1361_v50 = vmul.f32 0.0013020834, %v1352_v62  ;;  %v1360_v51 = vmul.f32 0.0056355274, %v1352_v62 }
 0x762   : > { %1368 = vrot.lane.b32.xlu0 %v1361_v50, %s1847_s11 }
 0x766   : > { %1385 = vperm.xlu0 %1776, %v1360_v51  }
 0x76a   : > { %1780 = vset.pattern.permute.xlu0 %v1848_v54 }
 0x7d4   : > { %v1369_v0 = vpop.permute.xlu0 %1368 }
 0x7d5   : > { %v1371_v1 = vmul.f32 %v1369_v0, %v1365_v63 }
 0x7d7   : > { %1373 = vrot.lane.b32.xlu1 %v1371_v1, %s1842_s10 }
 0x7db   : > { %1391 = vperm.xlu1 %1777, %v1361_v50  }
 0x7df   : > { %1778 = vset.pattern.permute.xlu1 %v1840_v47 }
 0x7e5   : > { %v1386_v7 = vpop.permute.xlu0 %1385 }
 0x7e6   : > { %v1388_v9 = vsel %vm1345_vm12, %v1386_v7, 0.0 }
 0x849   : > { %v1374_v56 = vpop.permute.xlu1 %1373 }
 0x84a   : > { %v1376_v3 = vadd.f32 %v1374_v56, %v1360_v51 }
 0x84c   : > { %1379 = vperm.xlu1 %1778, %v1376_v3  }
 0x850   : > { %1779 = vset.pattern.permute.xlu1 %v1848_v54 }
 0x851   : > { %1398 = vperm.xlu1 %1779, %v1361_v50  }
 0x85a   : > { %v1392_v6 = vpop.permute.xlu1 %1391 }
 0x85b   : > { %v1394_v4 = vsel %vm1349_vm13, %v1392_v6, 0.0 }
 0x8cb   : > { %v1380_v8 = vpop.permute.xlu1 %1379 }
 0x8cc   : > { %v1382_v5 = vsel %vm1342_vm11, %v1380_v8, 0.0 }
 0x8cd   : > { %v1389_v43 = vadd.f32 %v1388_v9, %v1382_v5 }
 0x8cf   : > { %v1395_v10 = vadd.f32 %v1394_v4, %v1389_v43 }
 0x8d0   : > { %v1399_v11 = vpop.permute.xlu1 %1398 }
 0x8d1   : > { %v1401_v47 = vsel %vm1396_vm14, %v1399_v11, 0.0 }
 0x8d2   : > { %v1402_v13 = vadd.f32 %v1401_v47, %v1395_v10 }
 0x8d4   : > { %1403 = vst [vmem:[%s312_s14] sm:$0xff] %v1402_v13 }
 0x8d5 PF: > { %s17_s23 = sadd.s32 1, %s1835_s23   ;;  %s2179_s21 = smov %s1831_s22 }
 0x8d6   : > { %p14_p5 = scmp.ge.s32.totalorder %s17_s23, 4   ;;  %s2180_s22 = smov %s2182_s24 }
 0x8d8   :  { %16 = sbr.rel (!%p14_p5) target bundleno = 2 (0x2), region = 93 }

</bundles_post_ra>
